<compile_context>
chip_gen: v5e
topology: v5e:2x2
jax: 0.10.0
libtpu: 0.0.40
codegen_flags: <defaults>
</compile_context>

<pallas_src>
import jax
import jax.numpy as jnp
from jax.experimental import pallas as pl
from jax.experimental.pallas import tpu as pltpu


def _swiglu_v2_kernel(x_ref, wg_ref, wu_ref, wd_ref, o_ref, acc_ref):
    k = pl.program_id(1)

    @pl.when(k == 0)
    def _():
        acc_ref[...] = jnp.zeros_like(acc_ref)

    x = x_ref[...]                                              # (tm, n_in)

    # Two independent MXU dots against the gate / up weight column tiles.
    gate = jnp.dot(x, wg_ref[...], preferred_element_type=jnp.float32)   # (tm, th)
    up = jnp.dot(x, wu_ref[...], preferred_element_type=jnp.float32)     # (tm, th)

    # silu(gate) * up ; sigmoid's exp runs on the EUP, multiplies on the VPU,
    # hidden under the down-projection matmul.
    h = gate * jax.nn.sigmoid(gate) * up                        # (tm, th) f32

    # Partial down-projection for this hidden tile, accumulated in f32.
    acc_ref[...] += jnp.dot(h.astype(wd_ref.dtype), wd_ref[...],
                            preferred_element_type=jnp.float32)

    @pl.when(k == pl.num_programs(1) - 1)
    def _():
        o_ref[...] = acc_ref[...].astype(o_ref.dtype)


def swiglu_v2(x, w_up_gate, w_down, *, tm: int | None = None, th: int | None = None):
    """x: (T, n_in); w_up_gate: (n_in, 2*n_hidden); w_down: (n_hidden, n_in)."""
    T, n_in = x.shape
    two_h = w_up_gate.shape[1]
    n_hidden = two_h // 2
    assert w_up_gate.shape == (n_in, 2 * n_hidden)
    assert w_down.shape == (n_hidden, n_in)

    # Static split of the fused weight (torch.chunk order: gate first, up second).
    w_gate = w_up_gate[:, :n_hidden]
    w_up = w_up_gate[:, n_hidden:]

    # Token tile: 512 keeps the 256-wide MXU tiles full on v6e/v7x and amortizes
    # weight DMA + per-grid-step overhead. Ragged token counts are zero-padded.
    if tm is None:
        tm = 512 if T > 512 else max(T, 1)
    T_pad = ((T + tm - 1) // tm) * tm
    x_in = x if T_pad == T else jnp.zeros((T_pad, n_in), x.dtype).at[:T].set(x)

    # Hidden (reduction) tile: weights stream through VMEM in 128-multiple
    # column tiles; per-step VMEM stays a few MiB regardless of model size.
    if th is None:
        th = next((c for c in (256, 128) if n_hidden % c == 0), n_hidden)
    assert n_hidden % th == 0, "hidden tile must divide n_hidden"

    grid = (T_pad // tm, n_hidden // th)

    itemsize = jnp.dtype(x.dtype).itemsize
    cost = pl.CostEstimate(
        flops=2 * T_pad * n_in * 3 * n_hidden,
        transcendentals=T_pad * n_hidden,
        bytes_accessed=(T_pad * n_in * itemsize                      # x
                        + 2 * n_in * n_hidden * jnp.dtype(w_up_gate.dtype).itemsize
                        + n_hidden * n_in * jnp.dtype(w_down.dtype).itemsize
                        + T_pad * n_in * itemsize),                  # out
    )

    out = pl.pallas_call(
        _swiglu_v2_kernel,
        out_shape=jax.ShapeDtypeStruct((T_pad, n_in), x.dtype),
        grid_spec=pltpu.PrefetchScalarGridSpec(
            num_scalar_prefetch=0,
            grid=grid,
            in_specs=[
                # token tile of activations (constant across the reduction axis)
                pl.BlockSpec((tm, n_in), lambda i, k: (i, 0)),
                # streamed weight column tiles
                pl.BlockSpec((n_in, th), lambda i, k: (0, k)),     # gate half
                pl.BlockSpec((n_in, th), lambda i, k: (0, k)),     # up half
                pl.BlockSpec((th, n_in), lambda i, k: (k, 0)),     # down proj rows
            ],
            # same output block across k -> stays resident in VMEM (accumulator)
            out_specs=pl.BlockSpec((tm, n_in), lambda i, k: (i, 0)),
            scratch_shapes=[pltpu.VMEM((tm, n_in), jnp.float32)],
        ),
        compiler_params=pltpu.CompilerParams(
            dimension_semantics=("parallel", "arbitrary"),
            # sized to fit v7x's 64 MiB/TC VMEM with headroom; plenty on v5e/v6e
            vmem_limit_bytes=56 * 1024 * 1024,
        ),
        cost_estimate=cost,
    )(x_in, w_gate, w_up, w_down)

    return out if T_pad == T else out[:T]


def swiglu_v2_ref(x, w_up_gate, w_down):
    ug = x.astype(jnp.float32) @ w_up_gate.astype(jnp.float32)
    h = ug.shape[-1] // 2
    gate, up = ug[:, :h], ug[:, h:]
    act = jax.nn.silu(gate) * up
    return (act @ w_down.astype(jnp.float32)).astype(x.dtype)


if __name__ == "__main__":
    # Small shapes consistent with the module: batch=2, seq=8, n_in=32, n_hidden=256.
    # th=128 is passed explicitly so the hidden-reduction grid (k=2 steps) is exercised.
    batch, seq, n_in, n_hidden = 2, 8, 32, 256
    T = batch * seq

    key = jax.random.PRNGKey(0)
    kx, kug, kdn = jax.random.split(key, 3)

    x = jax.random.normal(kx, (T, n_in), dtype=jnp.float32)
    # PyTorch: up_gate_proj.weight (2*n_hidden, n_in) -> stored here as (n_in, 2*n_hidden)
    w_up_gate = jax.random.normal(kug, (n_in, 2 * n_hidden), dtype=jnp.float32) * 0.05
    # PyTorch: down_proj.weight (n_in, n_hidden) -> stored here as (n_hidden, n_in)
    w_down = jax.random.normal(kdn, (n_hidden, n_in), dtype=jnp.float32) * 0.05

    out = swiglu_v2(x, w_up_gate, w_down, th=128)
    out = jax.block_until_ready(out)

    ref = swiglu_v2_ref(x, w_up_gate, w_down)
    assert out.shape == (T, n_in)
    assert jnp.allclose(out, ref, atol=1e-4, rtol=1e-4), "mismatch vs reference"

    print("KERNEL_OK")
</pallas_src>

<mosaic_0001>
module attributes {stable_mosaic.version = 11 : i64} {
  func.func @_swiglu_v2_kernel(%arg0: i32, %arg1: i32, %arg2: memref<16x32xf32, #tpu.memory_space<vmem>>, %arg3: memref<32x128xf32, #tpu.memory_space<vmem>>, %arg4: memref<32x128xf32, #tpu.memory_space<vmem>>, %arg5: memref<128x32xf32, #tpu.memory_space<vmem>>, %arg6: memref<16x32xf32, #tpu.memory_space<vmem>>, %arg7: memref<16x32xf32, #tpu.memory_space<vmem>>) attributes {dimension_semantics = [#tpu.dimension_semantics<parallel>, #tpu.dimension_semantics<arbitrary>], iteration_bounds = array<i64: 1, 2>, scalar_prefetch = 0 : i64, scratch_operands = 1 : i64, tpu.core_type = #tpu.core_type<tc>, window_params = [{transform_indices = @transform_0, window_bounds = array<i64: 16, 32>}, {transform_indices = @transform_1, window_bounds = array<i64: 32, 128>}, {transform_indices = @transform_2, window_bounds = array<i64: 32, 128>}, {transform_indices = @transform_3, window_bounds = array<i64: 128, 32>}, {transform_indices = @transform_4, window_bounds = array<i64: 16, 32>}]} {
    %c0_i32 = arith.constant 0 : i32
    %0 = arith.cmpi eq, %arg1, %c0_i32 : i32
    %1 = arith.extui %0 : i1 to i32
    %c0_i32_0 = arith.constant 0 : i32
    %2 = arith.cmpi ne, %1, %c0_i32_0 : i32
    scf.if %2 {
      %cst_16 = arith.constant 0.000000e+00 : f32
      %23 = vector.broadcast %cst_16 : f32 to vector<16x32xf32>
      %c0_17 = arith.constant 0 : index
      %c0_18 = arith.constant 0 : index
      %24 = vector.load %arg7[%c0_17, %c0_18] : memref<16x32xf32, #tpu.memory_space<vmem>>, vector<16x32xf32>
      tpu.vector_store %arg7[%c0_17, %c0_18], %23 {strides = array<i32>} : memref<16x32xf32, #tpu.memory_space<vmem>>, vector<16x32xf32>,
    } else {
    }
    %c0 = arith.constant 0 : index
    %c0_1 = arith.constant 0 : index
    %3 = vector.load %arg2[%c0, %c0_1] : memref<16x32xf32, #tpu.memory_space<vmem>>, vector<16x32xf32>
    %c0_2 = arith.constant 0 : index
    %c0_3 = arith.constant 0 : index
    %4 = vector.load %arg3[%c0_2, %c0_3] : memref<32x128xf32, #tpu.memory_space<vmem>>, vector<32x128xf32>
    %cst = arith.constant dense<0.000000e+00> : vector<16x128xf32>
    %5 = tpu.matmul %3, %4, %cst {dimension_numbers = #tpu.dot_dimension_numbers<[1], [0], [0], [1], [0, 0, 1, 1], [], []>} : vector<16x32xf32>, vector<32x128xf32>, vector<16x128xf32> -> vector<16x128xf32>
    %c0_4 = arith.constant 0 : index
    %c0_5 = arith.constant 0 : index
    %6 = vector.load %arg4[%c0_4, %c0_5] : memref<32x128xf32, #tpu.memory_space<vmem>>, vector<32x128xf32>
    %cst_6 = arith.constant dense<0.000000e+00> : vector<16x128xf32>
    %7 = tpu.matmul %3, %6, %cst_6 {dimension_numbers = #tpu.dot_dimension_numbers<[1], [0], [0], [1], [0, 0, 1, 1], [], []>} : vector<16x32xf32>, vector<32x128xf32>, vector<16x128xf32> -> vector<16x128xf32>
    %8 = arith.negf %5 : vector<16x128xf32>
    %9 = math.exp %8 : vector<16x128xf32>
    %cst_7 = arith.constant 1.000000e+00 : f32
    %10 = vector.broadcast %cst_7 : f32 to vector<16x128xf32>
    %11 = arith.addf %10, %9 : vector<16x128xf32>
    %12 = arith.divf %10, %11 : vector<16x128xf32>
    %13 = arith.mulf %5, %12 : vector<16x128xf32>
    %14 = arith.mulf %13, %7 : vector<16x128xf32>
    %c0_8 = arith.constant 0 : index
    %c0_9 = arith.constant 0 : index
    %15 = vector.load %arg7[%c0_8, %c0_9] : memref<16x32xf32, #tpu.memory_space<vmem>>, vector<16x32xf32>
    %c0_10 = arith.constant 0 : index
    %c0_11 = arith.constant 0 : index
    %16 = vector.load %arg5[%c0_10, %c0_11] : memref<128x32xf32, #tpu.memory_space<vmem>>, vector<128x32xf32>
    %cst_12 = arith.constant dense<0.000000e+00> : vector<16x32xf32>
    %17 = tpu.matmul %14, %16, %cst_12 {dimension_numbers = #tpu.dot_dimension_numbers<[1], [0], [0], [1], [0, 0, 1, 1], [], []>} : vector<16x128xf32>, vector<128x32xf32>, vector<16x32xf32> -> vector<16x32xf32>
    %18 = arith.addf %15, %17 : vector<16x32xf32>
    %c0_13 = arith.constant 0 : index
    %c0_14 = arith.constant 0 : index
    %19 = vector.load %arg7[%c0_13, %c0_14] : memref<16x32xf32, #tpu.memory_space<vmem>>, vector<16x32xf32>
    tpu.vector_store %arg7[%c0_13, %c0_14], %18 {strides = array<i32>} : memref<16x32xf32, #tpu.memory_space<vmem>>, vector<16x32xf32>,
    %c1_i32 = arith.constant 1 : i32
    %20 = arith.cmpi eq, %arg1, %c1_i32 : i32
    %21 = arith.extui %20 : i1 to i32
    %c0_i32_15 = arith.constant 0 : i32
    %22 = arith.cmpi ne, %21, %c0_i32_15 : i32
    scf.if %22 {
      %c0_16 = arith.constant 0 : index
      %c0_17 = arith.constant 0 : index
      %23 = vector.load %arg7[%c0_16, %c0_17] : memref<16x32xf32, #tpu.memory_space<vmem>>, vector<16x32xf32>
      %c0_18 = arith.constant 0 : index
      %c0_19 = arith.constant 0 : index
      %24 = vector.load %arg6[%c0_18, %c0_19] : memref<16x32xf32, #tpu.memory_space<vmem>>, vector<16x32xf32>
      tpu.vector_store %arg6[%c0_18, %c0_19], %23 {strides = array<i32>} : memref<16x32xf32, #tpu.memory_space<vmem>>, vector<16x32xf32>,
    } else {
    }
    return
  }
  func.func @transform_0(%arg0: i32, %arg1: i32) -> (i32, i32) {
    %c0_i32 = arith.constant 0 : i32
    %c0_i32_0 = arith.constant 0 : i32
    return %arg0, %c0_i32 : i32, i32
  }
  func.func @transform_1(%arg0: i32, %arg1: i32) -> (i32, i32) {
    %c0_i32 = arith.constant 0 : i32
    %c0_i32_0 = arith.constant 0 : i32
    return %c0_i32, %arg1 : i32, i32
  }
  func.func @transform_2(%arg0: i32, %arg1: i32) -> (i32, i32) {
    %c0_i32 = arith.constant 0 : i32
    %c0_i32_0 = arith.constant 0 : i32
    return %c0_i32, %arg1 : i32, i32
  }
  func.func @transform_3(%arg0: i32, %arg1: i32) -> (i32, i32) {
    %c0_i32 = arith.constant 0 : i32
    %c0_i32_0 = arith.constant 0 : i32
    return %arg1, %c0_i32 : i32, i32
  }
  func.func @transform_4(%arg0: i32, %arg1: i32) -> (i32, i32) {
    %c0_i32 = arith.constant 0 : i32
    %c0_i32_0 = arith.constant 0 : i32
    return %arg0, %c0_i32 : i32, i32
  }
}

</mosaic_0001>

<bundles_post_ra>
// kernel: tpu_custom_call.1
= control target key start
LH: loop header
LB: loop body
LE: loop exit
PB: predicated region body
PF: predicated region fallthrough
CT: control target
= control target key end

     0   :  { %9 = vsyncpa [#allocation6], 0  ;;  %s840_s15 = smov 0   ;;  %s842_s16 = smov 0   ;;  %s958_s0 = inlined_call_operand.vmem [shape: f32[16,32], index: 0, kind: input, shape index: {}]   ;;  %s959_s1 = inlined_call_operand.vmem [shape: f32[32,256], index: 1, kind: input, shape index: {}]   ;;  %s960_s2 = inlined_call_operand.vmem [shape: f32[32,256], index: 2, kind: input, shape index: {}]   ;;  %s961_s3 = inlined_call_operand.vmem [shape: f32[256,32], index: 3, kind: input, shape index: {}]   ;;  %s962_s4 = inlined_call_operand.hbm [shape: f32[16,32], index: 4, kind: output, shape index: {}]  }
   0x1   :  { %s844_s17 = smov 0   ;;  %s846_s18 = smov 0  }
   0x2   :  { %s848_s19 = smov 0  }
   0x3 LB: > { %s640_s20 = sadd.s32 4294967295, %s809_s19   ;;  %s24_s21 = sadd.s32 1, %s805_s18  ;;  %s809_s19 = sphi %s848_s19, %s15_s19   ;;  %s805_s18 = sphi %s846_s18, %s967_s18   ;;  %s801_s17 = sphi %s844_s17, %s966_s17   ;;  %s797_s16 = sphi %s842_s16, %s965_s16   ;;  %s793_s15 = sphi %s840_s15, %s964_s15  }
   0x4   : > { %p25_p0 = scmp.ge.s32.totalorder %s24_s21, 2  ;;  %p67_p1 = scmp.ne.s32.totalorder %s797_s16, %s793_s15 }
   0x5   : > { %p68_p2 = scmp.eq.s32.totalorder %s809_s19, 0  ;;  %s60_s24 = sadd.s32 1, %s797_s16 }
   0x6   : > { %s969_s21 = smov (%p25_p0, %s24_s21), 0  ;;  %p643_p5 = scmp.ge.s32.totalorder %s809_s19, 2 }
   0x7   : > { %p872_p3 = por %p68_p2, %p67_p1  ;;  %s57_s23 = ssub.s32 %s805_s18, %s969_s21 }
   0x8   : > { %p58_p4 = scmp.eq.s32.totalorder %s57_s23, 0  ;;  %180 = sbr.rel (%p643_p5) target bundleno = 29 (0x1d), region = 20 }
   0xa   : > { %s880_s25 = scalar_select %p58_p4, %s797_s16, %s60_s24  }
   0xd   : > { %183 = sbr.rel (!%p872_p3) target bundleno = 21 (0x15), region = 24  ;;  %s185_s26 = sand.u32 (%p872_p3), 1, %s797_s16  }
   0xe   : > { %s645_s27 = sshll.u32 (%p872_p3), %s805_s18, 3  ;;  %s644_s28 = sshll.u32 (%p872_p3), %s185_s26, 5 }
   0xf   : > { %s189_s5 = scalar_lea.vmem (%p872_p3), %s959_s1, %s645_s27  ;;  %s187_s6 = scalar_lea.vmem (%p872_p3), [#allocation3], %s644_s28 }
  0x10   : > { %v224_v0 = vld [vmem:[%s189_s5] sm:$0xff] (%p872_p3)  ;;  %v226_v1 = vld [vmem:[%s189_s5 + $0x10] sm:$0xff] (%p872_p3) }
  0x11   : > { %v228_v2 = vld [vmem:[%s189_s5 + $0x20] sm:$0xff] (%p872_p3)  ;;  %225 = vst [vmem:[%s187_s6] sm:$0xff] (%p872_p3), %v224_v0  ;;  %v230_v3 = vld [vmem:[%s189_s5 + $0x30] sm:$0xff] (%p872_p3) }
  0x12   : > { %227 = vst [vmem:[%s187_s6 + $0x8] sm:$0xff] %v226_v1 }
  0x13   : > { %229 = vst [vmem:[%s187_s6 + $0x10] sm:$0xff] %v228_v2 }
  0x14   : > { %231 = vst [vmem:[%s187_s6 + $0x18] sm:$0xff] %v230_v3 }
  0x15 PF: > { %237 = sbr.rel (!%p872_p3) target bundleno = 29 (0x1d), region = 62  ;;  %s239_s7 = sand.u32 (%p872_p3), 1, %s797_s16  }
  0x16   : > { %s647_s8 = sshll.u32 (%p872_p3), %s805_s18, 3  ;;  %s646_s9 = sshll.u32 (%p872_p3), %s239_s7, 5 }
  0x17   : > { %s243_s12 = scalar_lea.vmem (%p872_p3), %s960_s2, %s647_s8  ;;  %s241_s13 = scalar_lea.vmem (%p872_p3), [#allocation4], %s646_s9 }
  0x18   : > { %v278_v4 = vld [vmem:[%s243_s12] sm:$0xff] (%p872_p3)  ;;  %v280_v5 = vld [vmem:[%s243_s12 + $0x10] sm:$0xff] (%p872_p3) }
  0x19   : > { %v282_v6 = vld [vmem:[%s243_s12 + $0x20] sm:$0xff] (%p872_p3)  ;;  %279 = vst [vmem:[%s241_s13] sm:$0xff] (%p872_p3), %v278_v4  ;;  %v284_v7 = vld [vmem:[%s243_s12 + $0x30] sm:$0xff] (%p872_p3) }
  0x1a   : > { %281 = vst [vmem:[%s241_s13 + $0x8] sm:$0xff] %v280_v5 }
  0x1b   : > { %283 = vst [vmem:[%s241_s13 + $0x10] sm:$0xff] %v282_v6 }
  0x1c   : > { %285 = vst [vmem:[%s241_s13 + $0x18] sm:$0xff] %v284_v7 }
  0x1d PF: > { %p648_p6 = scmp.ge.s32.totalorder %s809_s19, 1  ;;  %p299_p7 = scmp.lt.s32.totalorder %s809_s19, 3 }
  0x1f   : > { %p300_p8 = pnand %p648_p6, %p299_p7 }
  0x20   : > { %s306_s14 = sand.u32 (!%p300_p8), 1, %s793_s15   ;;  %s651_s22 = sshll.u32 (!%p300_p8), %s801_s17, 4 }
  0x21   : > { %303 = sbr.rel (%p300_p8) target bundleno = 369 (0x171), region = 104  ;;  %s649_s23 = sshll.u32 (!%p300_p8), %s306_s14, 5 }
  0x22   : > { %p354_p9 = scmp.lt.s32.totalorder (!%p300_p8), %s651_s22, 31  ;;  %s308_s29 = scalar_lea.vmem (!%p300_p8), [#allocation3], %s649_s23 }
  0x23   : > { %s315_s30 = scalar_lea.vmem (!%p300_p8), [#allocation4], %s649_s23  ;;  %p653_p10 = scmp.ne.s32.totalorder (!%p300_p8), %s801_s17, 0 }
  0x26   : > { %s971_s22 = smov (!%p354_p9, %s651_s22), 31  ;;  %363 = sbr.rel (%p653_p10) target bundleno = 46 (0x2e), region = 116 }
  0x27   : > { %s652_s24 = sshll.u32 %s971_s22, 3 }
  0x28   : > { %s904_s28 = scalar_lea.vmem %s961_s3, %s652_s24 }
  0x2b   : > { %vm364_vm0 = vcmask 261120   ;;  %v811_v8 = vmov 0.0  }
  0x2c   : > { %365 = vst.msk [vmem:[#allocation2] sm:$0xff] %vm364_vm0, %v811_v8 }
  0x2d   : > { %366 = vst.msk [vmem:[#allocation2 + $0x8] sm:$0xff] %vm364_vm0, %v811_v8 }
  0x2e PF: > { %v372_v9 = vld [vmem:[%s308_s29 + $0x18] sm:$0xff]  ;;  %v371_v10 = vld [vmem:[%s308_s29 + $0x10] sm:$0xff]  ;;  %v370_v11 = vld [vmem:[%s308_s29 + $0x8] sm:$0xff]  ;;  %vm373_vm1 = vcmask 261120   ;;  %p660_p11 = scmp.ne.s32.totalorder %s801_s17, 1 }
  0x2f   : > { %392 = vmatpush.msra.mxu0 %v372_v9  ;;  %v406_v12 = vld [vmem:[%s315_s30 + $0x18] sm:$0xff]  ;;  %v405_v13 = vld [vmem:[%s315_s30 + $0x10] sm:$0xff]  ;;  %v369_v14 = vld [vmem:[%s308_s29] sm:$0xff] }
  0x30   : > { %419 = vmatpush.msra.mxu1 %v406_v12  ;;  %v404_v15 = vld [vmem:[%s315_s30 + $0x8] sm:$0xff]  ;;  %v367_v16 = vld [vmem:[%s958_s0] sm:$0xff]  ;;  %v403_v17 = vld [vmem:[%s315_s30] sm:$0xff] }
  0x31   : > { %393 = vmatpush.msra.mxu0 %v371_v10  ;;  %v368_v18 = vld [vmem:[%s958_s0 + $0x8] sm:$0xff]  ;;  %v489_v19 = vld [vmem:[%s904_s28 + $0x78] sm:$0xff]  ;;  %v488_v20 = vld [vmem:[%s904_s28 + $0x70] sm:$0xff] }
  0x32   : > { %420 = vmatpush.msra.mxu1 %v405_v13  ;;  %490 = vmatpush.msra.mxu2 %v489_v19  ;;  %v487_v21 = vld [vmem:[%s904_s28 + $0x68] sm:$0xff]  ;;  %v486_v22 = vld [vmem:[%s904_s28 + $0x60] sm:$0xff]  ;;  %v485_v23 = vld [vmem:[%s904_s28 + $0x58] sm:$0xff] }
  0x33   : > { %394 = vmatpush.msra.mxu0 %v370_v11  ;;  %665 = vmatpush.msra.mxu3 %v489_v19  ;;  %v484_v24 = vld [vmem:[%s904_s28 + $0x50] sm:$0xff]  ;;  %v483_v25 = vld [vmem:[%s904_s28 + $0x48] sm:$0xff]  ;;  %v482_v26 = vld [vmem:[%s904_s28 + $0x40] sm:$0xff] }
  0x34   : > { %421 = vmatpush.msra.mxu1 %v404_v15  ;;  %491 = vmatpush.msra.mxu2 %v488_v20  ;;  %v481_v27 = vld [vmem:[%s904_s28 + $0x38] sm:$0xff]  ;;  %v480_v28 = vld [vmem:[%s904_s28 + $0x30] sm:$0xff]  ;;  %v479_v29 = vld [vmem:[%s904_s28 + $0x28] sm:$0xff] }
  0x35   : > { %395 = vmatpush.msra.mxu0 %v369_v14  ;;  %666 = vmatpush.msra.mxu3 %v488_v20  ;;  %v478_v30 = vld [vmem:[%s904_s28 + $0x20] sm:$0xff]  ;;  %v477_v31 = vld [vmem:[%s904_s28 + $0x18] sm:$0xff]  ;;  %v476_v32 = vld [vmem:[%s904_s28 + $0x10] sm:$0xff] }
  0x36   : > { %654 = vmatmul.msk.f32.vlgmr.msra.gmra.mxu0 %vm373_vm1, %v367_v16  ;;  %422 = vmatpush.msra.mxu1 %v403_v17  ;;  %v475_v33 = vld [vmem:[%s904_s28 + $0x8] sm:$0xff]  ;;  %v474_v34 = vld [vmem:[%s904_s28] sm:$0xff] }
  0x37   : > { %656 = vmatmul.msk.f32.vlgmr.msra.gmra.mxu1 %vm373_vm1, %v367_v16  ;;  %492 = vmatpush.msra.mxu2 %v487_v21  ;;  %v472_v5 = vld [vmem:[#allocation2] sm:$0xff]  ;;  %v473_v8 = vld [vmem:[#allocation2 + $0x8] sm:$0xff] }
  0x38   : > { %667 = vmatpush.msra.mxu3 %v487_v21 }
  0x39   : > { %493 = vmatpush.msra.mxu2 %v486_v22 }
  0x3a   : > { %668 = vmatpush.msra.mxu3 %v486_v22 }
  0x3b   : > { %494 = vmatpush.msra.mxu2 %v485_v23 }
  0x3c   : > { %669 = vmatpush.msra.mxu3 %v485_v23 }
  0x3d   : > { %495 = vmatpush.msra.mxu2 %v484_v24 }
  0x3e   : > { %655 = vmatmul.msk.f32.gmra.mxu0 %vm373_vm1, %v368_v18  ;;  %670 = vmatpush.msra.mxu3 %v484_v24 }
  0x3f   : > { %657 = vmatmul.msk.f32.gmra.mxu1 %vm373_vm1, %v368_v18  ;;  %496 = vmatpush.msra.mxu2 %v483_v25 }
  0x40   : > { %671 = vmatpush.msra.mxu3 %v483_v25 }
  0x41   : > { %497 = vmatpush.msra.mxu2 %v482_v26 }
  0x42   : > { %672 = vmatpush.msra.mxu3 %v482_v26 }
  0x43   : > { %498 = vmatpush.msra.mxu2 %v481_v27 }
  0x44   : > { %673 = vmatpush.msra.mxu3 %v481_v27 }
  0x45   : > { %499 = vmatpush.msra.mxu2 %v480_v28 }
  0x46   : > { %674 = vmatpush.msra.mxu3 %v480_v28 }
  0x47   : > { %500 = vmatpush.msra.mxu2 %v479_v29 }
  0x48   : > { %675 = vmatpush.msra.mxu3 %v479_v29 }
  0x49   : > { %501 = vmatpush.msra.mxu2 %v478_v30 }
  0x4a   : > { %676 = vmatpush.msra.mxu3 %v478_v30 }
  0x4b   : > { %502 = vmatpush.msra.mxu2 %v477_v31 }
  0x4c   : > { %677 = vmatpush.msra.mxu3 %v477_v31 }
  0x4d   : > { %503 = vmatpush.msra.mxu2 %v476_v32 }
  0x4e   : > { %678 = vmatpush.msra.mxu3 %v476_v32 }
  0x4f   : > { %504 = vmatpush.msra.mxu2 %v475_v33 }
  0x50   : > { %679 = vmatpush.msra.mxu3 %v475_v33 }
  0x51   : > { %505 = vmatpush.msra.mxu2 %v474_v34 }
  0x52   : > { %680 = vmatpush.msra.mxu3 %v474_v34 }
  0xb3   : > { %v397_v35 = vpop.f32.mrf.mxu0 }
  0xb4   : > { %v658_v36 = vmul.f32 -1.442695, %v397_v35  ;;  %v424_v52 = vpop.f32.mrf.mxu1 }
  0xb6   : > { %731 = vpow2.f32 %v658_v36 }
  0xbb   : > { %v400_v37 = vpop.f32.mrf.mxu0 }
  0xbc   : > { %v732_v38 = vpop.eup %731  ;;  %v659_v39 = vmul.f32 -1.442695, %v400_v37  ;;  %v427_v2 = vpop.f32.mrf.mxu1 }
  0xbd   : > { %v436_v40 = vadd.f32 1.0, %v732_v38 }
  0xbe   : > { %733 = vpow2.f32 %v659_v39 }
  0xbf   : > { %735 = vrcp.f32 %v436_v40  ;;  %v449_v46 = vand.u32 2147483648, %v436_v40  ;;  %v447_v48 = vand.u32 2147483647, %v436_v40  ;;  %vm443_vm3 = vweird.f32 %v436_v40 }
  0xc1   : > { %v450_v51 = vor.u32 1.1754944e-38, %v449_v46  ;;  %vm448_vm5 = vcmp.eq.f32.partialorder %v447_v48, 8.507059e+37 }
  0xc4   : > { %v734_v41 = vpop.eup %733 }
  0xc5   : > { %v736_v42 = vpop.eup %735  ;;  %v437_v43 = vadd.f32 1.0, %v734_v41 }
  0xc6   : > { %v439_v44 = vmul.f32 %v736_v42, %v436_v40  ;;  %vm444_vm2 = vweird.f32 %v736_v42 }
  0xc7   : > { %737 = vrcp.f32 %v437_v43  ;;  %vm445_vm4 = vmor %vm443_vm3, %vm444_vm2  ;;  %v464_v58 = vand.u32 2147483648, %v437_v43  ;;  %v462_v60 = vand.u32 2147483647, %v437_v43  ;;  %vm458_vm7 = vweird.f32 %v437_v43 }
  0xc8   : > { %v440_v45 = vsub.f32 1.0, %v439_v44 }
  0xc9   : > { %v465_v63 = vor.u32 1.1754944e-38, %v464_v58  ;;  %vm463_vm9 = vcmp.eq.f32.partialorder %v462_v60, 8.507059e+37 }
  0xca   : > { %v441_v47 = vmul.f32 %v736_v42, %v440_v45 }
  0xcc   : > { %v442_v49 = vadd.f32 %v736_v42, %v441_v47 }
  0xcd   : > { %v738_v50 = vpop.eup %737 }
  0xce   : > { %v446_v53 = vsel %vm445_vm4, %v736_v42, %v442_v49  ;;  %v454_v54 = vmul.f32 %v738_v50, %v437_v43  ;;  %vm459_vm6 = vweird.f32 %v738_v50 }
  0xcf   : > { %v451_v55 = vsel %vm448_vm5, %v450_v51, %v446_v53  ;;  %vm460_vm8 = vmor %vm458_vm7, %vm459_vm6 }
  0xd0   : > { %v468_v56 = vmul.f32 %v451_v55, %v397_v35  ;;  %v455_v57 = vsub.f32 1.0, %v454_v54 }
  0xd2   : > { %v456_v59 = vmul.f32 %v738_v50, %v455_v57  ;;  %v470_v61 = vmul.f32 %v468_v56, %v424_v52 }
  0xd4   : > { %v457_v62 = vadd.f32 %v738_v50, %v456_v59  ;;  %506 = vmatmul.f32.vlgmr.msra.gmra.mxu2 %v470_v61 }
  0xd6   : > { %v461_v0 = vsel %vm460_vm8, %v738_v50, %v457_v62 }
  0xd7   : > { %v466_v1 = vsel %vm463_vm9, %v465_v63, %v461_v0 }
  0xd8   : > { %v469_v3 = vmul.f32 %v466_v1, %v400_v37 }
  0xda   : > { %v471_v4 = vmul.f32 %v469_v3, %v427_v2 }
  0xdc   : > { %509 = vmatmul.f32.vlgmr.msra.gmra.mxu3 %v471_v4 }
 0x157   : > { %v507_v6 = vpop.f32.mrf.mxu2 }
 0x158   : > { %v513_v7 = vadd.f32 %v507_v6, %v472_v5 }
 0x15a   : > { %515 = vst.msk [vmem:[#allocation2] sm:$0xff] %vm373_vm1, %v513_v7 }
 0x15e   : > { %520 = sbr.rel (%p660_p11) target bundleno = 363 (0x16b), region = 120 }
 0x15f   : > { %v510_v9 = vpop.f32.mrf.mxu3 }
 0x160   : > { %v514_v10 = vadd.f32 %v510_v9, %v473_v8 }
 0x162   : > { %516 = vst.msk [vmem:[#allocation2 + $0x8] sm:$0xff] %vm373_vm1, %v514_v10 }
 0x163   : > { %v521_v11 = vld [vmem:[#allocation2] sm:$0xff] }
 0x164   : > { %523 = vst.msk [vmem:[#allocation5] sm:$0xff] %vm373_vm1, %v521_v11 }
 0x169   : > { %v522_v12 = vld [vmem:[#allocation2 + $0x8] sm:$0xff] }
 0x16a   : > { %524 = vst.msk [vmem:[#allocation5 + $0x8] sm:$0xff] %vm373_vm1, %v522_v12 }
 0x16b PF: > { %p685_p12 = scmp.eq.s32.totalorder %s640_s20, 1  ;;  %s535_s10 = sshll.u32 %s962_s4, 4  ;;  %s536_s10 = int_to_ptr.hbm [resolvable:$true] %s535_s10 }
 0x16c   : > { %s812_s11 = smov [#allocation5]   ;;  %s813_s17 = smov 128  }
 0x16d   : > { %s533_s12 = sshll.u32 %s812_s11, 4  ;;  %s814_s13 = smov 8   ;;  %s534_s12 = int_to_ptr.vmem [resolvable:$true] %s533_s12 }
 0x16e   : > { %682 = dma.vmem_to_hbm [thread:$0]  (%p685_p12), %s534_s12, 256, %s536_s10, [#allocation6], %s813_s17, %s813_s17, %s814_s13  }
 0x16f   : > { %788 = dma.done.wait (%p685_p12), [#allocation6], 256  }
 0x170   : > { %790 = vsyncadd (%p685_p12), [#allocation6], 4294967040 }
 0x171 PF: > { %s15_s19 = sadd.s32 1, %s809_s19   ;;  %s964_s15 = smov %s797_s16 }
 0x172   : > { %p12_p13 = scmp.ge.s32.totalorder %s15_s19, 4   ;;  %s965_s16 = smov %s880_s25 }
 0x173   : > { %s966_s17 = smov %s805_s18  ;;  %s967_s18 = smov %s969_s21 }
 0x174   :  { %14 = sbr.rel (!%p12_p13) target bundleno = 3 (0x3), region = 167 }
 0x179   :  { %552 = vsyncpa [#allocation6], 1 }
 0x17a   :  { %554 = vsyncpa [#allocation6 + $0x1], 1 }

</bundles_post_ra>
